<compile_context>
chip_gen: v7x
topology: tpu7x:2x2x1
jax: 0.10.0
libtpu: 0.0.40
codegen_flags: <defaults>
</compile_context>

<pallas_src>
import jax
import jax.numpy as jnp
from jax.experimental import pallas as pl
from jax.experimental.pallas import tpu as pltpu


def _aggregator_kernel(mask_ref, hs_ref, w1_ref, w2_ref, out_ref):
    TB, S, D = hs_ref.shape
    NH = w2_ref.shape[1]

    hs = hs_ref[...]                                        # [TB, S, D] (io dtype)

    # ---- MLP attention logits: single tall matmul over all TB sequences ----
    h = jnp.dot(hs.reshape(TB * S, D), w1_ref[...],
                preferred_element_type=jnp.float32)         # [TB*S, H] f32
    h = jnp.tanh(h).astype(w2_ref.dtype)
    logits = jnp.dot(h, w2_ref[...],
                     preferred_element_type=jnp.float32)    # [TB*S, NH] f32
    logits = logits.reshape(TB, S, NH)

    # ---- additive mask, exactly the PyTorch `logits - 10000*(1-mask)` ----
    mask = mask_ref[...].astype(jnp.float32)                # [TB, S, 1]
    logits = logits - 10000.0 * (1.0 - mask)                # broadcast over heads

    # ---- softmax over the sequence axis (f32, exact reciprocal) ----
    m = jnp.max(logits, axis=1, keepdims=True)              # [TB, 1, NH]
    e = jnp.exp(logits - m)
    att = e / jnp.sum(e, axis=1, keepdims=True)             # [TB, S, NH]

    # ---- batched aggregation: att^T @ hs for all TB sequences in ONE matmul ----
    agg = jax.lax.dot_general(
        att.astype(hs.dtype), hs,
        dimension_numbers=(((1,), (1,)), ((0,), (0,))),     # contract S, batch TB
        preferred_element_type=jnp.float32)                 # [TB, NH, D]

    # Lane-dense store: fold [TB, NH, D] -> [TB, NH*D] once per tile.
    out_ref[...] = agg.reshape(TB, NH * D).astype(out_ref.dtype)


def _vmem_config():
    """(per-step VMEM budget, scoped vmem limit, min grid steps) per TPU generation."""
    try:
        cap = pltpu.get_tpu_info().vmem_capacity_bytes
    except Exception:
        cap = None
    if cap is None or cap <= 72 * 1024 * 1024:
        # v7x-class (64 MiB / TensorCore) or unknown: conservative budget, and keep
        # >= 2 grid steps so both TensorCores get work from the 'parallel' axis.
        return 40 * 1024 * 1024, 46 * 1024 * 1024, 2
    # v5e / v6e: 128 MiB VMEM, single TensorCore -> as few, fat steps as possible.
    return 88 * 1024 * 1024, 100 * 1024 * 1024, 1


def _block_vmem_bytes(TB, S, D, H, NH, io_bytes):
    """Working-set estimate: double-buffered blocks + weights + f32 intermediates."""
    f32 = 4
    hs_blk = TB * S * D * io_bytes
    mask_blk = TB * S * f32
    out_blk = TB * NH * D * f32
    weights = (D * H + H * NH) * io_bytes
    interm = TB * S * H * f32 + 3 * TB * S * NH * f32 + TB * NH * D * f32
    return 2 * (hs_blk + mask_blk + out_blk + weights) + interm


def _pick_batch_tile(B, S, D, H, NH, io_bytes, block_budget, min_steps):
    # Largest batch tile whose working set fits the budget.
    tb = 1
    for cand in range(1, B + 1):
        if _block_vmem_bytes(cand, S, D, H, NH, io_bytes) <= block_budget:
            tb = cand
        else:
            break
    if min_steps > 1:                       # v7x: keep >= 2 grid steps (2 TensorCores)
        tb = min(tb, -(-B // min_steps))
    if tb < B:
        tb = max(8, (tb // 8) * 8)          # sublane-aligned second-to-last block dim
    return max(1, min(tb, B))


def aggregator_forward(hidden_states, attention_mask, w1, w2, *, batch_tile=None):
    """hidden_states: [B, S, D]; attention_mask: [B, S] (0/1, any pattern);
    w1: [D, H]; w2: [H, NH].  Returns [B, NH*D] float32."""
    B, S, D = hidden_states.shape
    H = w1.shape[1]
    NH = w2.shape[1]

    block_budget, vmem_limit, min_steps = _vmem_config()
    io_bytes = hidden_states.dtype.itemsize

    TB = batch_tile if batch_tile is not None else _pick_batch_tile(
        B, S, D, H, NH, io_bytes, block_budget, min_steps)

    # No B % TB == 0 requirement: pad the batch (padded rows have an all-zero mask,
    # which is numerically safe, and are sliced off below).
    nb = -(-B // TB)
    B_pad = nb * TB
    mask = attention_mask.astype(jnp.float32).reshape(B, S, 1)
    hs = hidden_states
    if B_pad != B:
        hs = jnp.pad(hs, ((0, B_pad - B), (0, 0), (0, 0)))
        mask = jnp.pad(mask, ((0, B_pad - B), (0, 0), (0, 0)))

    out = pl.pallas_call(
        _aggregator_kernel,
        out_shape=jax.ShapeDtypeStruct((B_pad, NH * D), jnp.float32),
        grid_spec=pltpu.PrefetchScalarGridSpec(
            num_scalar_prefetch=0,
            grid=(nb,),
            in_specs=[
                pl.BlockSpec((TB, S, 1), lambda t: (t, 0, 0)),   # attention mask tile
                pl.BlockSpec((TB, S, D), lambda t: (t, 0, 0)),   # hidden_states tile
                pl.BlockSpec((D, H), lambda t: (0, 0)),          # W1 (resident)
                pl.BlockSpec((H, NH), lambda t: (0, 0)),         # W2 (resident)
            ],
            out_specs=pl.BlockSpec((TB, NH * D), lambda t: (t, 0)),  # lane-dense output
        ),
        compiler_params=pltpu.CompilerParams(
            dimension_semantics=("parallel",),
            vmem_limit_bytes=vmem_limit,
        ),
    )(mask, hs, w1, w2)

    return out[:B]                                           # [B, NH*D] (torch .view)


def aggregator_reference(hidden_states, attention_mask, w1, w2):
    """Pure-JAX reference mirroring the PyTorch forward (f32)."""
    B, S, D = hidden_states.shape
    NH = w2.shape[1]
    logits = jnp.tanh(hidden_states @ w1) @ w2                       # [B, S, NH]
    mask = attention_mask.astype(jnp.float32)[:, :, None]            # [B, S, 1]
    logits = logits - 10000.0 * (1.0 - mask)
    att = jax.nn.softmax(logits, axis=1)                             # softmax over seq
    agg = jnp.einsum("bsn,bsd->bnd", att, hidden_states)             # [B, NH, D]
    return agg.reshape(B, NH * D)


if __name__ == "__main__":
    # Small deterministic shapes consistent with the module.
    B, S, D = 4, 8, 32          # batch, seq_len, input_size
    H, NH = 64, 16              # hidden_size, num_heads

    key = jax.random.PRNGKey(0)
    k_hs, k_w1, k_w2 = jax.random.split(key, 3)

    hidden_states = jax.random.normal(k_hs, (B, S, D), dtype=jnp.float32)

    # Deterministic length-variable prefix masks (any 0/1 mask pattern is supported).
    lens = jnp.array([S, 5, 3, 6], dtype=jnp.int32)
    attention_mask = (jnp.arange(S)[None, :] < lens[:, None]).astype(jnp.float32)  # [B, S]

    # Deterministic parameter init (Linear weights, no bias), stored as [in, out].
    w1 = 0.1 * jax.random.normal(k_w1, (D, H), dtype=jnp.float32)
    w2 = 0.1 * jax.random.normal(k_w2, (H, NH), dtype=jnp.float32)

    ref = aggregator_reference(hidden_states, attention_mask, w1, w2)

    # f32 path: exact parity with the reference math.
    out = aggregator_forward(hidden_states, attention_mask, w1, w2)
    out = jax.block_until_ready(out)
    assert out.shape == (B, NH * D)
    assert jnp.allclose(out, ref, atol=2e-3, rtol=2e-3), "f32 kernel mismatch vs reference"

    # bf16-input path (halves HBM read traffic for this memory-bound kernel);
    # MXU matmuls run bf16 with f32 accumulation, softmax stays f32.
    out_bf16 = aggregator_forward(
        hidden_states.astype(jnp.bfloat16), attention_mask,
        w1.astype(jnp.bfloat16), w2.astype(jnp.bfloat16))
    out_bf16 = jax.block_until_ready(out_bf16)
    assert jnp.allclose(out_bf16, ref, atol=3e-2, rtol=3e-2), "bf16 kernel mismatch vs reference"

    print("KERNEL_OK")
</pallas_src>

<mosaic_0001>
module attributes {stable_mosaic.version = 11 : i64} {
  func.func @_aggregator_kernel(%arg0: i32, %arg1: memref<4x8x1xf32, #tpu.memory_space<vmem>>, %arg2: memref<4x8x32xf32, #tpu.memory_space<vmem>>, %arg3: memref<32x64xf32, #tpu.memory_space<vmem>>, %arg4: memref<64x16xf32, #tpu.memory_space<vmem>>, %arg5: memref<4x512xf32, #tpu.memory_space<vmem>>) attributes {dimension_semantics = [#tpu.dimension_semantics<parallel>], iteration_bounds = array<i64: 1>, scalar_prefetch = 0 : i64, scratch_operands = 0 : i64, tpu.core_type = #tpu.core_type<tc>, window_params = [{transform_indices = @transform_0, window_bounds = array<i64: 4, 8, 1>}, {transform_indices = @transform_1, window_bounds = array<i64: 4, 8, 32>}, {pipeline_mode = #tpu.pipeline_mode<synchronous>, transform_indices = @transform_2, window_bounds = array<i64: 32, 64>}, {pipeline_mode = #tpu.pipeline_mode<synchronous>, transform_indices = @transform_3, window_bounds = array<i64: 64, 16>}, {transform_indices = @transform_4, window_bounds = array<i64: 4, 512>}]} {
    %c0 = arith.constant 0 : index
    %c0_0 = arith.constant 0 : index
    %c0_1 = arith.constant 0 : index
    %0 = vector.load %arg2[%c0, %c0_0, %c0_1] : memref<4x8x32xf32, #tpu.memory_space<vmem>>, vector<4x8x32xf32>
    %1 = vector.shape_cast %0 : vector<4x8x32xf32> to vector<32x32xf32>
    %c0_2 = arith.constant 0 : index
    %c0_3 = arith.constant 0 : index
    %2 = vector.load %arg3[%c0_2, %c0_3] : memref<32x64xf32, #tpu.memory_space<vmem>>, vector<32x64xf32>
    %cst = arith.constant dense<0.000000e+00> : vector<32x64xf32>
    %3 = tpu.matmul %1, %2, %cst {dimension_numbers = #tpu.dot_dimension_numbers<[1], [0], [0], [1], [0, 0, 1, 1], [], []>} : vector<32x32xf32>, vector<32x64xf32>, vector<32x64xf32> -> vector<32x64xf32>
    %4 = math.tanh %3 : vector<32x64xf32>
    %c0_4 = arith.constant 0 : index
    %c0_5 = arith.constant 0 : index
    %5 = vector.load %arg4[%c0_4, %c0_5] : memref<64x16xf32, #tpu.memory_space<vmem>>, vector<64x16xf32>
    %cst_6 = arith.constant dense<0.000000e+00> : vector<32x16xf32>
    %6 = tpu.matmul %4, %5, %cst_6 {dimension_numbers = #tpu.dot_dimension_numbers<[1], [0], [0], [1], [0, 0, 1, 1], [], []>} : vector<32x64xf32>, vector<64x16xf32>, vector<32x16xf32> -> vector<32x16xf32>
    %7 = vector.shape_cast %6 : vector<32x16xf32> to vector<4x8x16xf32>
    %c0_7 = arith.constant 0 : index
    %c0_8 = arith.constant 0 : index
    %c0_9 = arith.constant 0 : index
    %8 = vector.load %arg1[%c0_7, %c0_8, %c0_9] : memref<4x8x1xf32, #tpu.memory_space<vmem>>, vector<4x8x1xf32>
    %cst_10 = arith.constant 1.000000e+00 : f32
    %9 = vector.broadcast %cst_10 : f32 to vector<4x8x1xf32>
    %10 = arith.subf %9, %8 : vector<4x8x1xf32>
    %cst_11 = arith.constant 1.000000e+04 : f32
    %11 = vector.broadcast %cst_11 : f32 to vector<4x8x1xf32>
    %12 = arith.mulf %11, %10 : vector<4x8x1xf32>
    %13 = vector.broadcast %12 : vector<4x8x1xf32> to vector<4x8x16xf32>
    %14 = arith.subf %7, %13 : vector<4x8x16xf32>
    %cst_12 = arith.constant dense<0xFF800000> : vector<4x16xf32>
    %15 = vector.multi_reduction <maximumf>, %14, %cst_12 [1] : vector<4x8x16xf32> to vector<4x16xf32>
    %16 = vector.shape_cast %15 : vector<4x16xf32> to vector<4x1x16xf32>
    %17 = vector.broadcast %16 : vector<4x1x16xf32> to vector<4x8x16xf32>
    %18 = arith.subf %14, %17 : vector<4x8x16xf32>
    %19 = math.exp %18 : vector<4x8x16xf32>
    %cst_13 = arith.constant dense<0.000000e+00> : vector<4x16xf32>
    %20 = vector.multi_reduction <add>, %19, %cst_13 [1] : vector<4x8x16xf32> to vector<4x16xf32>
    %21 = vector.shape_cast %20 : vector<4x16xf32> to vector<4x1x16xf32>
    %22 = vector.broadcast %21 : vector<4x1x16xf32> to vector<4x8x16xf32>
    %23 = arith.divf %19, %22 : vector<4x8x16xf32>
    %cst_14 = arith.constant dense<0.000000e+00> : vector<4x16x32xf32>
    %24 = tpu.matmul %23, %0, %cst_14 {dimension_numbers = #tpu.dot_dimension_numbers<[1], [1], [2], [2], [0, 0, 0, 2, 1, 2], [0], [0]>} : vector<4x8x16xf32>, vector<4x8x32xf32>, vector<4x16x32xf32> -> vector<4x16x32xf32>
    %25 = vector.shape_cast %24 : vector<4x16x32xf32> to vector<4x512xf32>
    %c0_15 = arith.constant 0 : index
    %c0_16 = arith.constant 0 : index
    %26 = vector.load %arg5[%c0_15, %c0_16] : memref<4x512xf32, #tpu.memory_space<vmem>>, vector<4x512xf32>
    tpu.vector_store %arg5[%c0_15, %c0_16], %25 {strides = array<i32>} : memref<4x512xf32, #tpu.memory_space<vmem>>, vector<4x512xf32>,
    return
  }
  func.func @transform_0(%arg0: i32) -> (i32, i32, i32) {
    %c0_i32 = arith.constant 0 : i32
    %c0_i32_0 = arith.constant 0 : i32
    %c0_i32_1 = arith.constant 0 : i32
    return %arg0, %c0_i32, %c0_i32_0 : i32, i32, i32
  }
  func.func @transform_1(%arg0: i32) -> (i32, i32, i32) {
    %c0_i32 = arith.constant 0 : i32
    %c0_i32_0 = arith.constant 0 : i32
    %c0_i32_1 = arith.constant 0 : i32
    return %arg0, %c0_i32, %c0_i32_0 : i32, i32, i32
  }
  func.func @transform_2(%arg0: i32) -> (i32, i32) {
    %c0_i32 = arith.constant 0 : i32
    %c0_i32_0 = arith.constant 0 : i32
    %c0_i32_1 = arith.constant 0 : i32
    return %c0_i32, %c0_i32_0 : i32, i32
  }
  func.func @transform_3(%arg0: i32) -> (i32, i32) {
    %c0_i32 = arith.constant 0 : i32
    %c0_i32_0 = arith.constant 0 : i32
    %c0_i32_1 = arith.constant 0 : i32
    return %c0_i32, %c0_i32_0 : i32, i32
  }
  func.func @transform_4(%arg0: i32) -> (i32, i32) {
    %c0_i32 = arith.constant 0 : i32
    %c0_i32_0 = arith.constant 0 : i32
    return %arg0, %c0_i32 : i32, i32
  }
}

</mosaic_0001>

<bundles_post_ra>
// kernel: tpu_custom_call.1
= control target key start
LH: loop header
LB: loop body
LE: loop exit
PB: predicated region body
PF: predicated region fallthrough
CT: control target
= control target key end

     0   :  { %vm26_vm0 = vcmask 261120   ;;  %s1358_s0 = inlined_call_operand.vmem [shape: f32[4,8,1], index: 0, kind: input, shape index: {}]   ;;  %s1359_s1 = inlined_call_operand.vmem [shape: f32[4,8,32], index: 1, kind: input, shape index: {}]   ;;  %s1360_s2 = inlined_call_operand.vmem [shape: f32[32,64], index: 2, kind: input, shape index: {}]   ;;  %s1361_s3 = inlined_call_operand.vmem [shape: f32[64,16], index: 3, kind: input, shape index: {}]   ;;  %s1362_s4 = inlined_call_operand.hbm [shape: f32[4,512], index: 4, kind: output, shape index: {}]  }
   0x1   :  { %v22_v0 = vld [vmem:[%s1360_s2] sm:$0xff]  ;;  %v23_v1 = vld [vmem:[%s1360_s2 + $0x8] sm:$0xff]  ;;  %v24_v2 = vld [vmem:[%s1360_s2 + $0x10] sm:$0xff] }
   0x2   :  { %v1125_v3 = vpack.c.bf16 %v23_v1, %v22_v0  ;;  %v25_v4 = vld [vmem:[%s1360_s2 + $0x18] sm:$0xff]  ;;  %v18_v5 = vld [vmem:[%s1359_s1] sm:$0xff]  ;;  %v129_v8 = vld [vmem:[%s1361_s3 + $0x8] sm:$0xff] }
   0x3   :  { %v1129_v6 = vpack.c.bf16 %v25_v4, %v24_v2  ;;  %1077 = vmatprep.mubr.msk.f32.mxu0 %vm26_vm0, %v18_v5  ;;  %v128_v7 = vld [vmem:[%s1361_s3] sm:$0xff] }
   0x4   :  { %1126 = vmatprep.subr.bf16.mxu0 %v1125_v3 }
   0x5   :  { %9 = vsyncpa [#allocation3], 0  ;;  %1128 = vmatpush3.bf16.msra.mxu0 %v1125_v3  ;;  %v1133_v9 = vpack.c.bf16 %v129_v8, %v128_v7  ;;  %v1265_v10 = vld [vmem:[%s1359_s1 + $0x8] sm:$0xff]  ;;  %v1270_v11 = vld [vmem:[%s1359_s1 + $0x10] sm:$0xff]  ;;  %v1207_v25 = vmov 0   ;;  %vm136_vm1 = vcmask 523264  }
   0x6   :  { %1130 = vmatprep.subr.bf16.mxu0 %v1129_v6  ;;  %v21_v12 = vld [vmem:[%s1359_s1 + $0x18] sm:$0xff]  ;;  %v130_v13 = vld [vmem:[%s1361_s3 + $0x10] sm:$0xff]  ;;  %v132_v16 = vld [vmem:[%s1361_s3 + $0x20] sm:$0xff]  ;;  %1157 = vset.pattern.permute.xlu0 %v1207_v25  ;;  %vm270_vm2 = vcmask 130048   ;;  %vm379_vm3 = vcmask 64512   ;;  %s1212_s26 = smov 32  }
   0x7   :  { %1134 = vmatprep.subr.bf16.mxu1 %v1133_v9  ;;  %v131_v14 = vld [vmem:[%s1361_s3 + $0x18] sm:$0xff]  ;;  %v133_v17 = vld [vmem:[%s1361_s3 + $0x28] sm:$0xff]  ;;  %v134_v19 = vld [vmem:[%s1361_s3 + $0x30] sm:$0xff]  ;;  %1158 = vset.pattern.permute.xlu1 %v1207_v25  ;;  %s1213_s27 = smov 96   ;;  %vm986_vm4 = vcmask 785408   ;;  %s1214_s28 = smov [#allocation2]  }
   0x8   :  { %1136 = vmatpush3.bf16.msra.mxu1 %v1133_v9  ;;  %v1137_v15 = vpack.c.bf16 %v131_v14, %v130_v13  ;;  %v1141_v18 = vpack.c.bf16 %v133_v17, %v132_v16  ;;  %v135_v20 = vld [vmem:[%s1361_s3 + $0x38] sm:$0xff]  ;;  %v234_v22 = vld [vmem:[%s1358_s0] sm:$0xff]  ;;  %v236_v23 = vld [vmem:[%s1358_s0 + $0x10] sm:$0xff]  ;;  %s1013_s2 = sshll.u32 %s1214_s28, 4  ;;  %s1014_s2 = int_to_ptr.vmem [resolvable:$true] %s1013_s2 }
   0x9   :  { %1132 = vmatpush3.bf16.msra.mxu0 %v1129_v6  ;;  %v1145_v21 = vpack.c.bf16 %v135_v20, %v134_v19  ;;  %v235_v24 = vld [vmem:[%s1358_s0 + $0x8] sm:$0xff]  ;;  %v238_v26 = vsub.f32 1.0, %v234_v22  ;;  %v240_v27 = vsub.f32 1.0, %v236_v23  ;;  %v237_v29 = vld [vmem:[%s1358_s0 + $0x18] sm:$0xff]  ;;  %s1210_s0 = smov 64   ;;  %s1183_s29 = scalar_lea.vmem %s1014_s2, 256 }
   0xa   :  { %1105 = vmatprep.subr.mxu0 %v18_v5  ;;  %1138 = vmatprep.subr.bf16.mxu1 %v1137_v15  ;;  %v239_v28 = vsub.f32 1.0, %v235_v24  ;;  %v241_v30 = vsub.f32 1.0, %v237_v29  ;;  %p1184_p0 = scmp.ne.s32.totalorder %s1014_s2, %s1183_s29  ;;  %p1188_p1 = scmp.lt.s32.totalorder %s1014_s2, %s1014_s2 }
   0xb   :  { %v242_v31 = vmul.f32 10000.0, %v238_v26  ;;  %v244_v32 = vmul.f32 10000.0, %v240_v27  ;;  %p1189_p2 = scmp.lt.s32.totalorder %s1183_s29, %s1183_s29 }
   0xc   :  { %1078 = vmatmul.mubr.msk.f32.vlgmr.msra.gmra.mrb[0].mxu0 %vm26_vm0, %v1265_v10  ;;  %1140 = vmatpush3.bf16.msra.mxu1 %v1137_v15  ;;  %v243_v33 = vmul.f32 10000.0, %v239_v28  ;;  %v245_v34 = vmul.f32 10000.0, %v241_v30 }
   0xd   :  { %1080 = vmatprep.mubr.msk.f32.mxu0 %vm26_vm0, %v1270_v11  ;;  %1106 = vmatpush3.msra.mxu0 %v18_v5  ;;  %p1190_p3 = por %p1189_p2, %p1188_p1 }
   0xe   :  { %1110 = vmatprep.subr.mxu0 %v1265_v10  ;;  %1142 = vmatprep.subr.bf16.mxu1 %v1141_v18 }
   0xf   :  { %248 = vperm.xlu0 %1157, %v242_v31   ;;  %258 = vperm.xlu1 %1158, %v244_v32   ;;  %p1191_p4 = pnand %p1190_p3, %p1184_p0 }
  0x10   :  { %1081 = vmatmul.mubr.msk.f32.gmra.mrb[2].mxu0 %vm26_vm0, %v21_v12  ;;  %1144 = vmatpush3.bf16.msra.mxu1 %v1141_v18 }
  0x11   :  { %1146 = vmatprep.subr.bf16.mxu1 %v1145_v21 }
  0x13   :  { %253 = vperm.xlu0 %1157, %v243_v33   ;;  %263 = vperm.xlu1 %1158, %v245_v34  }
  0x14   :  { %1148 = vmatpush3.bf16.msra.mxu1 %v1145_v21 }
  0x15   :  { %1120 = vmatprep.subr.mxu1 %v21_v12 }
  0x8e   :  { %v249_v43 = vpop.permute.xlu0 %248  ;;  %v259_v44 = vpop.permute.xlu1 %258 }
  0x92   :  { %v254_v45 = vpop.permute.xlu0 %253  ;;  %v264_v50 = vpop.permute.xlu1 %263 }
  0xdf   :  { %v1079_v35 = vpop.f32.mrb[0].mxu0 }
  0xe0   :  { %v105_v36 = vpop.f32.mrb[1].mxu0 }
  0xe1   :  { %1159 = vtanh.f32 %v105_v36 }
  0xe2   :  { %1161 = vtanh.f32 %v1079_v35 }
  0xe3   :  { %v1082_v37 = vpop.f32.mrb[2].mxu0 }
  0xe4   :  { %1163 = vtanh.f32 %v1082_v37  ;;  %v115_v38 = vpop.f32.mrb[3].mxu0 }
  0xe5   :  { %1165 = vtanh.f32 %v115_v38 }
  0xeb   :  { %v1160_v39 = vpop.eup %1159 }
  0xec   :  { %v1162_v40 = vpop.eup %1161  ;;  %1099 = vmatprep.mubr.msk.f32.mxu1 %vm136_vm1, %v1160_v39 }
  0xed   :  { %1100 = vmatmul.mubr.msk.f32.vlgmr.msra.gmra.mrb[0].mxu1 %vm136_vm1, %v1162_v40 }
  0xee   :  { %v1164_v41 = vpop.eup %1163  ;;  %1121 = vmatpush3.msra.mxu1 %v21_v12 }
  0xef   :  { %v1166_v42 = vpop.eup %1165 }
  0xf0   :  { %1102 = vmatprep.mubr.msk.f32.mxu1 %vm136_vm1, %v1166_v42 }
  0xf1   :  { %1103 = vmatmul.mubr.msk.f32.gmra.mrb[2].mxu1 %vm136_vm1, %v1164_v41 }
 0x1c0   :  { %v1101_v46 = vpop.f32.mrb[0].mxu1 }
 0x1c1   :  { %v267_v47 = vsub.f32 %v1101_v46, %v254_v45  ;;  %v215_v48 = vpop.f32.mrb[1].mxu1 }
 0x1c2   :  { %v266_v49 = vsub.f32 %v215_v48, %v249_v43 }
 0x1c3   :  { %v278_v51 = vsel %vm270_vm2, %v267_v47, -inf }
 0x1c4   :  { %v279_v52 = vrot.slane %v278_v51, 4  ;;  %v271_v53 = vsel %vm270_vm2, %v266_v49, -inf  ;;  %v1104_v54 = vpop.f32.mrb[2].mxu1 }
 0x1c5   :  { %v272_v55 = vrot.slane %v271_v53, 4  ;;  %v269_v56 = vsub.f32 %v1104_v54, %v264_v50  ;;  %v225_v57 = vpop.f32.mrb[3].mxu1 }
 0x1c6   :  { %v280_v58 = vmax.f32 %v278_v51, %v279_v52  ;;  %v268_v59 = vsub.f32 %v225_v57, %v259_v44 }
 0x1c7   :  { %v273_v60 = vmax.f32 %v271_v53, %v272_v55  ;;  %v292_v61 = vsel %vm270_vm2, %v269_v56, -inf }
 0x1c8   :  { %v281_v62 = vrot.slane %v280_v58, 2  ;;  %v293_v63 = vrot.slane %v292_v61, 4  ;;  %v285_v0 = vsel %vm270_vm2, %v268_v59, -inf }
 0x1c9   :  { %v274_v1 = vrot.slane %v273_v60, 2  ;;  %v286_v2 = vrot.slane %v285_v0, 4 }
 0x1ca   :  { %v282_v3 = vmax.f32 %v280_v58, %v281_v62  ;;  %v294_v4 = vmax.f32 %v292_v61, %v293_v63 }
 0x1cb   :  { %v275_v5 = vmax.f32 %v273_v60, %v274_v1  ;;  %v287_v6 = vmax.f32 %v285_v0, %v286_v2 }
 0x1cc   :  { %v283_v7 = vrot.slane %v282_v3, 1  ;;  %v295_v8 = vrot.slane %v294_v4, 2 }
 0x1cd   :  { %v276_v9 = vrot.slane %v275_v5, 1  ;;  %v288_v12 = vrot.slane %v287_v6, 2 }
 0x1ce   :  { %v284_v13 = vmax.f32 %v282_v3, %v283_v7  ;;  %v296_v14 = vmax.f32 %v294_v4, %v295_v8 }
 0x1cf   :  { %v277_v15 = vmax.f32 %v275_v5, %v276_v9  ;;  %v289_v16 = vmax.f32 %v287_v6, %v288_v12 }
 0x1d0   :  { %v300_v17 = vsub.f32 %v267_v47, %v284_v13  ;;  %v297_v18 = vrot.slane %v296_v14, 1 }
 0x1d1   :  { %v299_v19 = vsub.f32 %v266_v49, %v277_v15  ;;  %v290_v20 = vrot.slane %v289_v16, 1 }
 0x1d2   :  { %v305_v21 = vmul.f32 1.442695, %v300_v17  ;;  %v298_v22 = vmax.f32 %v296_v14, %v297_v18  ;;  %v1208_v18 = vmov 1983009808  }
 0x1d3   :  { %v303_v23 = vmul.f32 1.442695, %v299_v19  ;;  %v291_v24 = vmax.f32 %v289_v16, %v290_v20  ;;  %v803_v19 = vunpack.c.l.s4 %v1208_v18  ;;  %v805_v20 = vlaneseq }
 0x1d4   :  { %1167 = vpow2.f32 %v305_v21  ;;  %v302_v25 = vsub.f32 %v269_v56, %v298_v22 }
 0x1d5   :  { %1169 = vpow2.f32 %v303_v23  ;;  %v301_v26 = vsub.f32 %v268_v59, %v291_v24 }
 0x1d6   :  { %v309_v27 = vmul.f32 1.442695, %v302_v25 }
 0x1d7   :  { %v307_v28 = vmul.f32 1.442695, %v301_v26  ;;  %v1209_v26 = vmov 1934713408  }
 0x1d8   :  { %1171 = vpow2.f32 %v309_v27  ;;  %v835_v27 = vunpack.c.l.s4 %v1209_v26 }
 0x1d9   :  { %1173 = vpow2.f32 %v307_v28  ;;  %v804_v28 = vunpack.c.0.s8 %v803_v19 }
 0x1de   :  { %v1168_v29 = vpop.eup %1167 }
 0x1df   :  { %v1170_v30 = vpop.eup %1169  ;;  %v318_v31 = vsel %vm270_vm2, %v1168_v29, 0.0 }
 0x1e0   :  { %v319_v32 = vrot.slane %v318_v31, 4  ;;  %v311_v33 = vsel %vm270_vm2, %v1170_v30, 0.0 }
 0x1e1   :  { %v312_v34 = vrot.slane %v311_v33, 4 }
 0x1e2   :  { %v1172_v35 = vpop.eup %1171  ;;  %v320_v36 = vadd.f32 %v319_v32, %v318_v31 }
 0x1e3   :  { %v1174_v37 = vpop.eup %1173  ;;  %v313_v38 = vadd.f32 %v312_v34, %v311_v33  ;;  %v332_v39 = vsel %vm270_vm2, %v1172_v35, 0.0 }
 0x1e4   :  { %v321_v40 = vrot.slane %v320_v36, 2  ;;  %v333_v41 = vrot.slane %v332_v39, 4  ;;  %v325_v42 = vsel %vm270_vm2, %v1174_v37, 0.0 }
 0x1e5   :  { %v314_v43 = vrot.slane %v313_v38, 2  ;;  %v326_v44 = vrot.slane %v325_v42, 4 }
 0x1e6   :  { %v334_v45 = vadd.f32 %v333_v41, %v332_v39  ;;  %v322_v46 = vadd.f32 %v321_v40, %v320_v36 }
 0x1e7   :  { %v327_v47 = vadd.f32 %v326_v44, %v325_v42  ;;  %v315_v48 = vadd.f32 %v314_v43, %v313_v38 }
 0x1e8   :  { %v335_v49 = vrot.slane %v334_v45, 2  ;;  %v323_v50 = vrot.slane %v322_v46, 1 }
 0x1e9   :  { %v328_v51 = vrot.slane %v327_v47, 2  ;;  %v316_v52 = vrot.slane %v315_v48, 1 }
 0x1ea   :  { %v324_v53 = vadd.f32 %v323_v50, %v322_v46  ;;  %v336_v54 = vadd.f32 %v335_v49, %v334_v45 }
 0x1eb   :  { %v317_v55 = vadd.f32 %v316_v52, %v315_v48  ;;  %v329_v56 = vadd.f32 %v328_v51, %v327_v47 }
 0x1ec   :  { %1175 = vrcp.f32 %v324_v53  ;;  %v337_v58 = vrot.slane %v336_v54, 1 }
 0x1ed   :  { %1177 = vrcp.f32 %v317_v55  ;;  %v330_v57 = vrot.slane %v329_v56, 1 }
 0x1ee   :  { %v338_v60 = vadd.f32 %v337_v58, %v336_v54 }
 0x1ef   :  { %v331_v59 = vadd.f32 %v330_v57, %v329_v56 }
 0x1f1   :  { %1179 = vrcp.f32 %v331_v59 }
 0x1f2   :  { %1181 = vrcp.f32 %v338_v60 }
 0x1f6   :  { %v1176_v61 = vpop.eup %1175 }
 0x1f7   :  { %v1178_v62 = vpop.eup %1177  ;;  %v342_v63 = vmul.f32 %v1176_v61, %v1168_v29  ;;  %v806_v29 = vshrl.u32 %v805_v20, 7  ;;  %v1211_v61 = vmov 0.0  }
 0x1f8   :  { %v340_v0 = vmul.f32 %v1178_v62, %v1170_v30  ;;  %v836_v30 = vunpack.c.0.s8 %v835_v27 }
 0x1f9   :  { %461 = vxpose.xlu1.b32.start.end [1/1] (short) (narrow) %v342_v63, 16  ;;  %v807_v31 = vsub.s32 %v804_v28, %v806_v29 }
 0x1fa   :  { %347 = vxpose.xlu0.b32.start.end [1/1] (short) (narrow) %v340_v0, 16  ;;  %v839_v38 = vsub.s32 %v836_v30, %v806_v29 }
 0x1fb   :  { %v1180_v1 = vpop.eup %1179 }
 0x1fc   :  { %v344_v2 = vmul.f32 %v1180_v1, %v1174_v37  ;;  %v1182_v3 = vpop.eup %1181 }
 0x1fd   :  { %v346_v4 = vmul.f32 %v1182_v3, %v1172_v35 }
 0x1ff   :  { %574 = vxpose.xlu0.b32.start.end [1/1] (short) (narrow) %v344_v2, 16 }
 0x204   :  { %687 = vxpose.xlu0.b32.start.end [1/1] (short) (narrow) %v346_v4, 16 }
 0x279   :  { %v477_v6 = vpop.trf.xlu1 }
 0x27a   :  { %v363_v5 = vpop.trf.xlu0 }
 0x27b   :  { %1107 = vmatprep.mubr.msk.f32.mxu0 %vm379_vm3, %v363_v5 }
 0x27d   :  { %v478_v8 = vpop.trf.xlu1 }
 0x27e   :  { %v364_v7 = vpop.trf.xlu0 }
 0x27f   :  { %1108 = vmatmul.mubr.msk.f32.vlgmr.msra.gmra.mrb[4].mxu0 %vm379_vm3, %v364_v7 }
 0x280   :  { %1111 = vmatpush3.msra.mxu0 %v1265_v10  ;;  %1112 = vmatprep.mubr.msk.f32.mxu0 %vm379_vm3, %v477_v6 }
 0x281   :  { %1115 = vmatprep.subr.mxu0 %v1270_v11 }
 0x282   :  { %v590_v9 = vpop.trf.xlu0 }
 0x283   :  { %1113 = vmatmul.mubr.msk.f32.vlgmr.msra.gmra.mrb[6].mxu0 %vm379_vm3, %v478_v8 }
 0x284   :  { %1117 = vmatprep.mubr.msk.f32.mxu0 %vm379_vm3, %v590_v9  ;;  %1116 = vmatpush3.msra.mxu0 %v1270_v11 }
 0x286   :  { %v591_v12 = vpop.trf.xlu0 }
 0x287   :  { %1118 = vmatmul.mubr.msk.f32.vlgmr.msra.gmra.mrb[8].mxu0 %vm379_vm3, %v591_v12 }
 0x28a   :  { %v703_v13 = vpop.trf.xlu0 }
 0x28b   :  { %1122 = vmatprep.mubr.msk.f32.mxu1 %vm379_vm3, %v703_v13 }
 0x28e   :  { %v704_v14 = vpop.trf.xlu0 }
 0x28f   :  { %1123 = vmatmul.mubr.msk.f32.vlgmr.msra.gmra.mrb[4].mxu1 %vm379_vm3, %v704_v14 }
 0x352   :  { %v1109_v10 = vpop.f32.mrb[4].mxu0 }
 0x353   :  { %v452_v15 = vpop.f32.mrb[5].mxu0 }
 0x356   :  { %v1114_v16 = vpop.f32.mrb[6].mxu0 }
 0x357   :  { %v565_v17 = vpop.f32.mrb[7].mxu0 }
 0x35a   :  { %v1119_v21 = vpop.f32.mrb[8].mxu0 }
 0x35b   :  { %v868_v22 = vcombine.low %v1109_v10, %v1119_v21  ;;  %v869_v23 = vcombine.high %v1109_v10, %v1119_v21  ;;  %v678_v11 = vpop.f32.mrb[9].mxu0 }
 0x35c   :  { %v800_v24 = vcombine.low %v452_v15, %v678_v11  ;;  %v801_v25 = vcombine.high %v452_v15, %v678_v11 }
 0x35d   :  { %v876_v39 = vrot.slane %v868_v22, %v807_v31  ;;  %v883_v40 = vrot.slane %v869_v23, %v807_v31 }
 0x35e   :  { %v808_v43 = vrot.slane %v800_v24, %v807_v31  ;;  %v815_v44 = vrot.slane %v801_v25, %v807_v31 }
 0x362   :  { %v1124_v32 = vpop.f32.mrb[4].mxu1 }
 0x363   :  { %v884_v33 = vcombine.low %v1114_v16, %v1124_v32  ;;  %v885_v34 = vcombine.high %v1114_v16, %v1124_v32  ;;  %v791_v35 = vpop.f32.mrb[5].mxu1 }
 0x364   :  { %v816_v36 = vcombine.low %v565_v17, %v791_v35  ;;  %v817_v37 = vcombine.high %v565_v17, %v791_v35 }
 0x365   :  { %v892_v41 = vrot.slane %v884_v33, %v807_v31  ;;  %v899_v42 = vrot.slane %v885_v34, %v807_v31 }
 0x366   :  { %v824_v45 = vrot.slane %v816_v36, %v807_v31  ;;  %v831_v46 = vrot.slane %v817_v37, %v807_v31 }
 0x367   :  { %v900_v47 = vcombine.low %v876_v39, %v892_v41  ;;  %v901_v48 = vcombine.high %v876_v39, %v892_v41  ;;  %v916_v49 = vcombine.low %v883_v40, %v899_v42  ;;  %v917_v50 = vcombine.high %v883_v40, %v899_v42 }
 0x368   :  { %v832_v51 = vcombine.low %v808_v43, %v824_v45  ;;  %v833_v52 = vcombine.high %v808_v43, %v824_v45  ;;  %v848_v53 = vcombine.low %v815_v44, %v831_v46  ;;  %v849_v54 = vcombine.high %v815_v44, %v831_v46 }
 0x369   :  { %v931_v55 = vrot.slane %v917_v50, %v839_v38  ;;  %v915_v56 = vrot.slane %v901_v48, %v839_v38  ;;  %v908_v59 = vrot.slane %v900_v47, %v839_v38  ;;  %v924_v0 = vrot.slane %v916_v49, %v839_v38 }
 0x36a   :  { %v863_v57 = vrot.slane %v849_v54, %v839_v38  ;;  %v847_v58 = vrot.slane %v833_v52, %v839_v38  ;;  %v840_v60 = vrot.slane %v832_v51, %v839_v38  ;;  %v856_v3 = vrot.slane %v848_v53, %v839_v38 }
 0x36b   :  { %977 = vrot.lane.b32.xlu0 %v931_v55, %s1210_s0  ;;  %965 = vrot.lane.b32.xlu1 %v915_v56, %s1210_s0  ;;  %v932_v62 = vcombine.high %v908_v59, %v1211_v61  ;;  %v934_v1 = vcombine.high %v924_v0, %v1211_v61  ;;  %v935_v5 = vcombine.high %v931_v55, %v1211_v61 }
 0x36c   :  { %v864_v63 = vcombine.high %v840_v60, %v1211_v61  ;;  %v867_v2 = vcombine.high %v863_v57, %v1211_v61  ;;  %v866_v4 = vcombine.high %v856_v3, %v1211_v61  ;;  %v865_v6 = vcombine.high %v847_v58, %v1211_v61 }
 0x36d   :  { %v933_v7 = vcombine.high %v915_v56, %v1211_v61 }
 0x36f   :  { %953 = vrot.lane.b32.xlu0 %v863_v57, %s1210_s0  ;;  %941 = vrot.lane.b32.xlu1 %v847_v58, %s1210_s0 }
 0x373   :  { %961 = vrot.lane.b32.xlu1 %v932_v62, %s1212_s26  ;;  %937 = vrot.lane.b32.xlu0 %v864_v63, %s1212_s26 }
 0x377   :  { %973 = vrot.lane.b32.xlu1 %v934_v1, %s1212_s26  ;;  %957 = vrot.lane.b32.xlu0 %v867_v2, %s1213_s27 }
 0x37b   :  { %949 = vrot.lane.b32.xlu1 %v866_v4, %s1212_s26  ;;  %981 = vrot.lane.b32.xlu0 %v935_v5, %s1213_s27 }
 0x37f   :  { %945 = vrot.lane.b32.xlu1 %v865_v6, %s1213_s27 }
 0x383   :  { %969 = vrot.lane.b32.xlu1 %v933_v7, %s1213_s27 }
 0x3dd   :  { %v978_v8 = vpop.permute.xlu0 %977  ;;  %v966_v9 = vpop.permute.xlu1 %965 }
 0x3e1   :  { %v954_v12 = vpop.permute.xlu0 %953  ;;  %v942_v13 = vpop.permute.xlu1 %941 }
 0x3e5   :  { %v962_v14 = vpop.permute.xlu1 %961  ;;  %v938_v10 = vpop.permute.xlu0 %937 }
 0x3e6   :  { %v984_v18 = vsel %vm26_vm0, %v840_v60, %v938_v10  ;;  %v991_v23 = vsel %vm26_vm0, %v908_v59, %v962_v14 }
 0x3e7   :  { %v985_v22 = vsel %vm136_vm1, %v984_v18, %v942_v13  ;;  %v992_v29 = vsel %vm136_vm1, %v991_v23, %v966_v9 }
 0x3e9   :  { %v974_v15 = vpop.permute.xlu1 %973  ;;  %v958_v16 = vpop.permute.xlu0 %957 }
 0x3ea   :  { %v994_v11 = vsel %vm26_vm0, %v924_v0, %v974_v15 }
 0x3eb   :  { %v995_v28 = vsel %vm136_vm1, %v994_v11, %v978_v8 }
 0x3ed   :  { %v950_v17 = vpop.permute.xlu1 %949  ;;  %v982_v26 = vpop.permute.xlu0 %981 }
 0x3ee   :  { %v988_v19 = vsel %vm26_vm0, %v856_v3, %v950_v17  ;;  %v996_v31 = vsel %vm986_vm4, %v995_v28, %v982_v26 }
 0x3ef   :  { %v989_v20 = vsel %vm136_vm1, %v988_v19, %v954_v12 }
 0x3f0   :  { %v990_v25 = vsel %vm986_vm4, %v989_v20, %v958_v16 }
 0x3f1   :  { %v946_v21 = vpop.permute.xlu1 %945 }
 0x3f2   :  { %v987_v24 = vsel %vm986_vm4, %v985_v22, %v946_v21 }
 0x3f3   :  { %v1001_v27 = vcombine.low %v987_v24, %v990_v25 }
 0x3f5   :  { %1005 = vst [vmem:[#allocation2] sm:$0xff] %v1001_v27  ;;  %v970_v30 = vpop.permute.xlu1 %969 }
 0x3f6   :  { %v993_v32 = vsel %vm986_vm4, %v992_v29, %v970_v30 }
 0x3f7   :  { %v1002_v33 = vcombine.low %v993_v32, %v996_v31 }
 0x3f9   :  { %1006 = vst [vmem:[#allocation2 + $0x8] sm:$0xff] %v1002_v33 }
 0x3fa   :  { %1194 = shalt.err (!%p1191_p4)
}
 0x3fb   :  { %s1195_s6 = scalar_lea.hbm %s1362_s4, 256 }
 0x3fc   :  { %p1196_p5 = scmp.ne.s32.totalorder %s1362_s4, %s1195_s6  ;;  %p1199_p6 = scmp.lt.u32.totalorder %s1195_s6, %s1362_s4 }
 0x3fe   :  { %p1201_p7 = pnand %p1199_p6, %p1196_p5 }
 0x400   :  { %1204 = shalt.err (!%p1201_p7)
}
 0x401   :  { %1016 = dma.vmem_to_hbm [thread:$0]  %s1014_s2, 256, %s1362_s4, [#allocation3]  }
 0x402   :  { %1205 = dma.done.wait [#allocation3], 256  }
 0x403   :  { %1206 = vsyncadd [#allocation3], 4294967040 }
 0x404   :  { %1020 = vsyncpa [#allocation3], 1 }

</bundles_post_ra>
